<compile_context>
chip_gen: v6e
topology: v6e:2x2x1
jax: 0.10.0
libtpu: 0.0.40
codegen_flags: <defaults>
</compile_context>

<pallas_src>
import functools

import jax
import jax.numpy as jnp
from jax.experimental import pallas as pl
from jax.experimental.pallas import tpu as pltpu

EPS = 1e-5  # nn.GroupNorm default


def fusion_kernel(x_ref, w_ref, p_ref, out_ref, *, cc, tile_c, inv_n):
    # x_ref  : (2C, N)        full input, resident (constant index_map, 1 buffer)
    # w_ref  : (tile_c, 2C)   1x1-conv weight tile for this channel block
    # p_ref  : (tile_c, 2)    column 0 = gamma, column 1 = beta
    # out_ref: (3, tile_c, N) slabs 0/1 = passthrough copies, slab 2 = fused+GN
    i = pl.program_id(0)
    off0 = pl.multiple_of(i * tile_c, tile_c)
    off1 = pl.multiple_of(i * tile_c + cc, tile_c)

    # Passthrough slabs (feats = objs.view(2, C, N)), copied straight from the
    # already-resident input tile -> no extra HBM read, no wrapper concat.
    out_ref[0] = x_ref[pl.ds(off0, tile_c), :]
    out_ref[1] = x_ref[pl.ds(off1, tile_c), :]

    # 1x1 Conv1d == matmul over the channel dim (MXU), accumulate in f32.
    y = jnp.dot(w_ref[...], x_ref[...], preferred_element_type=jnp.float32)

    # Two-pass per-channel GroupNorm(C, C) stats (numerically robust).
    mu = jnp.sum(y, axis=-1, keepdims=True) * inv_n
    d = y - mu
    var = jnp.sum(d * d, axis=-1, keepdims=True) * inv_n

    gamma = p_ref[:, 0:1].astype(jnp.float32)
    beta = p_ref[:, 1:2].astype(jnp.float32)
    scale = gamma * jax.lax.rsqrt(var + EPS)          # (tile_c, 1)

    out_ref[2] = (d * scale + beta).astype(out_ref.dtype)


def _device_kind():
    try:
        return jax.devices()[0].device_kind.lower()
    except Exception:
        return ""


def _auto_tile_c(c, dtype):
    """Largest divisor of c <= the MXU row cap, multiple of the sublane packing."""
    kind = _device_kind()
    cap = 128 if "v5" in kind else 256      # v5e MXU: 4x128^2; v6e/v7x: 2x256^2
    step = 16 if jnp.dtype(dtype).itemsize < 4 else 8
    if c <= cap or c % step != 0:
        return c
    t = cap - (cap % step)
    while t > step and c % t != 0:
        t -= step
    return t if (t >= step and c % t == 0) else c


def _vmem_ceiling():
    kind = _device_kind()
    if "v5" in kind:
        return 32 << 20       # 128 MiB physical, conservative scoped ceiling
    if "v6" in kind:
        return 96 << 20       # 128 MiB physical, lift the one-size 32 MiB clamp
    return 48 << 20           # v7x (64 MiB physical) and unknown parts


def _spec(block_shape, index_map, buffers=None):
    """BlockSpec with optional explicit buffer count (fallback if unsupported)."""
    if buffers is not None and hasattr(pl, "Buffered"):
        try:
            return pl.BlockSpec(block_shape, index_map,
                                pipeline_mode=pl.Buffered(buffers))
        except TypeError:
            pass
    return pl.BlockSpec(block_shape, index_map)


def fusion_module_a(objs, w, b, gamma, beta, *, tile_c=None):
    """objs: (1, 2C, N); w: (C, 2C); b, gamma, beta: (C,). Returns (3, C, N).

    `b` (Conv1d bias) is accepted for interface parity with the PyTorch module
    but with GroupNorm(num_groups=C) every channel is its own group, so a
    per-channel constant is exactly cancelled by the mean subtraction and is
    never sent to the kernel.
    """
    del b
    _, D, N = objs.shape
    C = D // 2
    x = objs.reshape(D, N)                      # free reshape, no copy

    if tile_c is None:
        tile_c = _auto_tile_c(C, objs.dtype)
    assert C % tile_c == 0, "C must be divisible by tile_c"
    steps = C // tile_c

    params = jnp.stack([gamma, beta], axis=-1)  # (C, 2): one DMA instead of two

    # VMEM budget: resident single-buffered input, double-buffered weight and
    # output tiles, single-buffered params, f32 matmul intermediate, headroom.
    elt = jnp.dtype(objs.dtype).itemsize
    n_lanes = ((N + 127) // 128) * 128
    need = (
        D * n_lanes * elt                        # x (Buffered(1))
        + 2 * tile_c * D * elt                   # w tile (double-buffered)
        + tile_c * 128 * elt                     # gamma/beta tile (Buffered(1))
        + 2 * 3 * tile_c * n_lanes * elt         # output tile (double-buffered)
        + 3 * tile_c * n_lanes * 4               # f32 y / centered / scaled temps
    )
    vmem_limit = int(min(max(need + (2 << 20), 8 << 20), _vmem_ceiling()))

    # Megacore split only pays off when per-core work hides the duplicated
    # resident-input DMA and the per-core launch/pipeline-fill cost.
    parallel = steps > 1 and (C * N) >= (1 << 20)
    semantics = ("parallel",) if parallel else ("arbitrary",)

    kernel = functools.partial(
        fusion_kernel, cc=C, tile_c=tile_c, inv_n=1.0 / float(N))

    # TODO(synk): for very large N, add an inner "arbitrary" N grid axis with
    # streaming s1/s2 accumulation instead of a VMEM-resident full-N tile.
    return pl.pallas_call(
        kernel,
        out_shape=jax.ShapeDtypeStruct((3, C, N), objs.dtype),
        grid_spec=pltpu.PrefetchScalarGridSpec(
            num_scalar_prefetch=0,
            grid=(steps,),
            in_specs=[
                _spec((D, N), lambda i: (0, 0), buffers=1),       # full input
                _spec((tile_c, D), lambda i: (i, 0)),             # weight tile
                _spec((tile_c, 2), lambda i: (i, 0), buffers=1),  # gamma/beta
            ],
            out_specs=_spec((3, tile_c, N), lambda i: (0, i, 0)),
        ),
        compiler_params=pltpu.CompilerParams(
            dimension_semantics=semantics,
            vmem_limit_bytes=vmem_limit,
        ),
    )(x, w, params)


def _reference(objs, w, b, gamma, beta):
    _, D, N = objs.shape
    C = D // 2
    x = objs[0].astype(jnp.float32)
    y = w.astype(jnp.float32) @ x + b.astype(jnp.float32)[:, None]
    mu = y.mean(-1, keepdims=True)
    var = ((y - mu) ** 2).mean(-1, keepdims=True)
    yn = (y - mu) / jnp.sqrt(var + EPS) * gamma.astype(jnp.float32)[:, None] \
        + beta.astype(jnp.float32)[:, None]
    feats = objs.reshape(2, C, N)
    return jnp.concatenate([feats, yn[None].astype(objs.dtype)], axis=0)


if __name__ == "__main__":
    out_channels = 64   # C
    N = 200             # number of objects
    D = out_channels * 2

    key = jax.random.PRNGKey(0)
    k_x, k_w, k_b, k_g, k_be = jax.random.split(key, 5)

    objs = jax.random.normal(k_x, (1, D, N), dtype=jnp.float32)
    w = jax.random.normal(k_w, (out_channels, D), dtype=jnp.float32) * 0.1
    b = jax.random.normal(k_b, (out_channels,), dtype=jnp.float32) * 0.1
    gamma = 1.0 + 0.1 * jax.random.normal(k_g, (out_channels,), dtype=jnp.float32)
    beta = 0.1 * jax.random.normal(k_be, (out_channels,), dtype=jnp.float32)

    # Default tile_c = C -> grid=(1,): one grid step, no megacore overhead.
    out = jax.block_until_ready(fusion_module_a(objs, w, b, gamma, beta))

    ref = _reference(objs, w, b, gamma, beta)
    assert out.shape == (3, out_channels, N)
    assert jnp.allclose(out, ref, atol=1e-4, rtol=1e-4)

    print("KERNEL_OK")
</pallas_src>

<mosaic_0001>
module attributes {stable_mosaic.version = 11 : i64} {
  func.func @fusion_kernel(%arg0: i32, %arg1: memref<128x200xf32, #tpu.memory_space<vmem>>, %arg2: memref<64x128xf32, #tpu.memory_space<vmem>>, %arg3: memref<64x2xf32, #tpu.memory_space<vmem>>, %arg4: memref<3x64x200xf32, #tpu.memory_space<vmem>>) attributes {dimension_semantics = [#tpu.dimension_semantics<arbitrary>], iteration_bounds = array<i64: 1>, scalar_prefetch = 0 : i64, scratch_operands = 0 : i64, tpu.core_type = #tpu.core_type<tc>, window_params = [{pipeline_mode = #tpu.pipeline_mode<synchronous>, transform_indices = @transform_0, window_bounds = array<i64: 128, 200>}, {transform_indices = @transform_1, window_bounds = array<i64: 64, 128>}, {pipeline_mode = #tpu.pipeline_mode<synchronous>, transform_indices = @transform_2, window_bounds = array<i64: 64, 2>}, {transform_indices = @transform_3, window_bounds = array<i64: 3, 64, 200>}]} {
    %c64_i32 = arith.constant 64 : i32
    %0 = arith.muli %arg0, %c64_i32 : i32
    %1 = tpu.assume_multiple %0, 64 : i32
    %c64_i32_0 = arith.constant 64 : i32
    %2 = arith.muli %arg0, %c64_i32_0 : i32
    %c64_i32_1 = arith.constant 64 : i32
    %3 = arith.addi %2, %c64_i32_1 : i32
    %4 = tpu.assume_multiple %3, 64 : i32
    %5 = arith.index_cast %1 : i32 to index
    %c0 = arith.constant 0 : index
    %6 = vector.load %arg1[%5, %c0] : memref<128x200xf32, #tpu.memory_space<vmem>>, vector<64x200xf32>
    %c0_2 = arith.constant 0 : index
    %c0_3 = arith.constant 0 : index
    %c0_4 = arith.constant 0 : index
    %7 = vector.load %arg4[%c0_2, %c0_3, %c0_4] : memref<3x64x200xf32, #tpu.memory_space<vmem>>, vector<1x64x200xf32>
    %8 = vector.shape_cast %7 : vector<1x64x200xf32> to vector<64x200xf32>
    %9 = vector.shape_cast %6 : vector<64x200xf32> to vector<1x64x200xf32>
    tpu.vector_store %arg4[%c0_2, %c0_3, %c0_4], %9 {strides = array<i32>} : memref<3x64x200xf32, #tpu.memory_space<vmem>>, vector<1x64x200xf32>,
    %10 = arith.index_cast %4 : i32 to index
    %c0_5 = arith.constant 0 : index
    %11 = vector.load %arg1[%10, %c0_5] : memref<128x200xf32, #tpu.memory_space<vmem>>, vector<64x200xf32>
    %c1 = arith.constant 1 : index
    %c0_6 = arith.constant 0 : index
    %c0_7 = arith.constant 0 : index
    %12 = vector.load %arg4[%c1, %c0_6, %c0_7] : memref<3x64x200xf32, #tpu.memory_space<vmem>>, vector<1x64x200xf32>
    %13 = vector.shape_cast %12 : vector<1x64x200xf32> to vector<64x200xf32>
    %14 = vector.shape_cast %11 : vector<64x200xf32> to vector<1x64x200xf32>
    tpu.vector_store %arg4[%c1, %c0_6, %c0_7], %14 {strides = array<i32>} : memref<3x64x200xf32, #tpu.memory_space<vmem>>, vector<1x64x200xf32>,
    %c0_8 = arith.constant 0 : index
    %c0_9 = arith.constant 0 : index
    %15 = vector.load %arg2[%c0_8, %c0_9] : memref<64x128xf32, #tpu.memory_space<vmem>>, vector<64x128xf32>
    %c0_10 = arith.constant 0 : index
    %c0_11 = arith.constant 0 : index
    %16 = vector.load %arg1[%c0_10, %c0_11] : memref<128x200xf32, #tpu.memory_space<vmem>>, vector<128x200xf32>
    %cst = arith.constant dense<0.000000e+00> : vector<64x200xf32>
    %17 = tpu.matmul %15, %16, %cst {dimension_numbers = #tpu.dot_dimension_numbers<[1], [0], [0], [1], [0, 0, 1, 1], [], []>} : vector<64x128xf32>, vector<128x200xf32>, vector<64x200xf32> -> vector<64x200xf32>
    %cst_12 = arith.constant dense<0.000000e+00> : vector<64xf32>
    %18 = vector.multi_reduction <add>, %17, %cst_12 [1] : vector<64x200xf32> to vector<64xf32>
    %19 = vector.shape_cast %18 : vector<64xf32> to vector<64x1xf32>
    %cst_13 = arith.constant 5.000000e-03 : f32
    %20 = vector.broadcast %cst_13 : f32 to vector<64x1xf32>
    %21 = arith.mulf %19, %20 : vector<64x1xf32>
    %22 = vector.broadcast %21 : vector<64x1xf32> to vector<64x200xf32>
    %23 = arith.subf %17, %22 : vector<64x200xf32>
    %24 = arith.mulf %23, %23 : vector<64x200xf32>
    %cst_14 = arith.constant dense<0.000000e+00> : vector<64xf32>
    %25 = vector.multi_reduction <add>, %24, %cst_14 [1] : vector<64x200xf32> to vector<64xf32>
    %26 = vector.shape_cast %25 : vector<64xf32> to vector<64x1xf32>
    %cst_15 = arith.constant 5.000000e-03 : f32
    %27 = vector.broadcast %cst_15 : f32 to vector<64x1xf32>
    %28 = arith.mulf %26, %27 : vector<64x1xf32>
    %c0_16 = arith.constant 0 : index
    %c0_17 = arith.constant 0 : index
    %29 = vector.load %arg3[%c0_16, %c0_17] : memref<64x2xf32, #tpu.memory_space<vmem>>, vector<64x1xf32>
    %c0_18 = arith.constant 0 : index
    %c1_19 = arith.constant 1 : index
    %30 = vector.load %arg3[%c0_18, %c1_19] : memref<64x2xf32, #tpu.memory_space<vmem>>, vector<64x1xf32>
    %cst_20 = arith.constant 9.99999974E-6 : f32
    %31 = vector.broadcast %cst_20 : f32 to vector<64x1xf32>
    %32 = arith.addf %28, %31 : vector<64x1xf32>
    %33 = math.rsqrt %32 : vector<64x1xf32>
    %34 = arith.mulf %29, %33 : vector<64x1xf32>
    %35 = vector.broadcast %34 : vector<64x1xf32> to vector<64x200xf32>
    %36 = arith.mulf %23, %35 : vector<64x200xf32>
    %37 = vector.broadcast %30 : vector<64x1xf32> to vector<64x200xf32>
    %38 = arith.addf %36, %37 : vector<64x200xf32>
    %c2 = arith.constant 2 : index
    %c0_21 = arith.constant 0 : index
    %c0_22 = arith.constant 0 : index
    %39 = vector.load %arg4[%c2, %c0_21, %c0_22] : memref<3x64x200xf32, #tpu.memory_space<vmem>>, vector<1x64x200xf32>
    %40 = vector.shape_cast %39 : vector<1x64x200xf32> to vector<64x200xf32>
    %41 = vector.shape_cast %38 : vector<64x200xf32> to vector<1x64x200xf32>
    tpu.vector_store %arg4[%c2, %c0_21, %c0_22], %41 {strides = array<i32>} : memref<3x64x200xf32, #tpu.memory_space<vmem>>, vector<1x64x200xf32>,
    return
  }
  func.func @transform_0(%arg0: i32) -> (i32, i32) {
    %c0_i32 = arith.constant 0 : i32
    %c0_i32_0 = arith.constant 0 : i32
    %c0_i32_1 = arith.constant 0 : i32
    return %c0_i32, %c0_i32_0 : i32, i32
  }
  func.func @transform_1(%arg0: i32) -> (i32, i32) {
    %c0_i32 = arith.constant 0 : i32
    %c0_i32_0 = arith.constant 0 : i32
    return %arg0, %c0_i32 : i32, i32
  }
  func.func @transform_2(%arg0: i32) -> (i32, i32) {
    %c0_i32 = arith.constant 0 : i32
    %c0_i32_0 = arith.constant 0 : i32
    return %arg0, %c0_i32 : i32, i32
  }
  func.func @transform_3(%arg0: i32) -> (i32, i32, i32) {
    %c0_i32 = arith.constant 0 : i32
    %c0_i32_0 = arith.constant 0 : i32
    %c0_i32_1 = arith.constant 0 : i32
    return %c0_i32, %arg0, %c0_i32_0 : i32, i32, i32
  }
}

</mosaic_0001>

<bundles_post_ra>
// kernel: tpu_custom_call.1
= control target key start
LH: loop header
LB: loop body
LE: loop exit
PB: predicated region body
PF: predicated region fallthrough
CT: control target
= control target key end

     0   :  { %s1005_s0 = inlined_call_operand.vmem [shape: f32[128,200], index: 0, kind: input, shape index: {}]   ;;  %s1006_s1 = inlined_call_operand.vmem [shape: f32[64,128], index: 1, kind: input, shape index: {}]   ;;  %s1007_s2 = inlined_call_operand.vmem [shape: f32[64,2], index: 2, kind: input, shape index: {}]   ;;  %s1008_s3 = inlined_call_operand.hbm [shape: f32[3,64,200], index: 3, kind: output, shape index: {}]  }
   0x1   :  { %v666_v0 = vld [vmem:[%s1005_s0 + $0xf8] sm:$0xff]  ;;  %v131_v1 = vld [vmem:[%s1005_s0 + $0xf0] sm:$0xff]  ;;  %v674_v2 = vld [vmem:[%s1005_s0 + $0xe8] sm:$0xff] }
   0x2   :  { %133 = vmatprep.subr.mxu0 %v666_v0  ;;  %555 = vmatprep.subr.mxu1 %v666_v0  ;;  %v129_v3 = vld [vmem:[%s1005_s0 + $0xe0] sm:$0xff]  ;;  %v127_v4 = vld [vmem:[%s1005_s0 + $0xd0] sm:$0xff]  ;;  %91 = vst [vmem:[#allocation2 + $0xf0] sm:$0xff] %v131_v1  ;;  %v687_v5 = vld [vmem:[%s1005_s0 + $0xd8] sm:$0xff] }
   0x3   :  { %134 = vmatpush1.msra.mxu0 %v131_v1  ;;  %571 = vmatpush1.msra.mxu1 %v131_v1  ;;  %v125_v6 = vld [vmem:[%s1005_s0 + $0xc0] sm:$0xff]  ;;  %87 = vst [vmem:[#allocation2 + $0xd0] sm:$0xff] %v127_v4  ;;  %89 = vst [vmem:[#allocation2 + $0xe0] sm:$0xff] %v129_v3  ;;  %v123_v7 = vld [vmem:[%s1005_s0 + $0xb0] sm:$0xff] }
   0x4   :  { %135 = vmatprep.subr.mxu0 %v674_v2  ;;  %556 = vmatprep.subr.mxu1 %v674_v2  ;;  %v121_v8 = vld [vmem:[%s1005_s0 + $0xa0] sm:$0xff]  ;;  %85 = vst [vmem:[#allocation2 + $0xc0] sm:$0xff] %v125_v6  ;;  %v703_v9 = vld [vmem:[%s1005_s0 + $0xc8] sm:$0xff]  ;;  %v119_v10 = vld [vmem:[%s1005_s0 + $0x90] sm:$0xff] }
   0x5   :  { %136 = vmatpush1.msra.mxu0 %v129_v3  ;;  %572 = vmatpush1.msra.mxu1 %v129_v3  ;;  %81 = vst [vmem:[#allocation2 + $0xa0] sm:$0xff] %v121_v8  ;;  %83 = vst [vmem:[#allocation2 + $0xb0] sm:$0xff] %v123_v7  ;;  %v117_v11 = vld [vmem:[%s1005_s0 + $0x80] sm:$0xff]  ;;  %v115_v12 = vld [vmem:[%s1005_s0 + $0x70] sm:$0xff] }
   0x6   :  { %137 = vmatprep.subr.mxu0 %v687_v5  ;;  %557 = vmatprep.subr.mxu1 %v687_v5  ;;  %79 = vst [vmem:[#allocation2 + $0x90] sm:$0xff] %v119_v10  ;;  %v719_v13 = vld [vmem:[%s1005_s0 + $0xb8] sm:$0xff]  ;;  %v113_v14 = vld [vmem:[%s1005_s0 + $0x60] sm:$0xff]  ;;  %53 = vst [vmem:[#allocation2 + $0x70] sm:$0xff] %v115_v12 }
   0x7   :  { %138 = vmatpush1.msra.mxu0 %v127_v4  ;;  %573 = vmatpush1.msra.mxu1 %v127_v4  ;;  %77 = vst [vmem:[#allocation2 + $0x80] sm:$0xff] %v117_v11  ;;  %v111_v15 = vld [vmem:[%s1005_s0 + $0x50] sm:$0xff]  ;;  %v109_v16 = vld [vmem:[%s1005_s0 + $0x40] sm:$0xff]  ;;  %51 = vst [vmem:[#allocation2 + $0x60] sm:$0xff] %v113_v14 }
   0x8   :  { %139 = vmatprep.subr.mxu0 %v703_v9  ;;  %558 = vmatprep.subr.mxu1 %v703_v9  ;;  %v735_v17 = vld [vmem:[%s1005_s0 + $0xa8] sm:$0xff]  ;;  %v107_v18 = vld [vmem:[%s1005_s0 + $0x30] sm:$0xff]  ;;  %47 = vst [vmem:[#allocation2 + $0x40] sm:$0xff] %v109_v16  ;;  %49 = vst [vmem:[#allocation2 + $0x50] sm:$0xff] %v111_v15 }
   0x9   :  { %140 = vmatpush1.msra.mxu0 %v125_v6  ;;  %574 = vmatpush1.msra.mxu1 %v125_v6  ;;  %v105_v19 = vld [vmem:[%s1005_s0 + $0x20] sm:$0xff]  ;;  %v103_v20 = vld [vmem:[%s1005_s0 + $0x10] sm:$0xff]  ;;  %45 = vst [vmem:[#allocation2 + $0x30] sm:$0xff] %v107_v18  ;;  %v751_v21 = vld [vmem:[%s1005_s0 + $0x98] sm:$0xff] }
   0xa   :  { %141 = vmatprep.subr.mxu0 %v719_v13  ;;  %559 = vmatprep.subr.mxu1 %v719_v13  ;;  %v101_v22 = vld [vmem:[%s1005_s0] sm:$0xff]  ;;  %41 = vst [vmem:[#allocation2 + $0x10] sm:$0xff] %v103_v20  ;;  %43 = vst [vmem:[#allocation2 + $0x20] sm:$0xff] %v105_v19  ;;  %v761_v23 = vld [vmem:[%s1005_s0 + $0x88] sm:$0xff] }
   0xb   :  { %142 = vmatpush1.msra.mxu0 %v123_v7  ;;  %575 = vmatpush1.msra.mxu1 %v123_v7  ;;  %38 = vst [vmem:[#allocation2] sm:$0xff] %v101_v22 }
   0xc   :  { %143 = vmatprep.subr.mxu0 %v735_v17  ;;  %560 = vmatprep.subr.mxu1 %v735_v17 }
   0xd   :  { %144 = vmatpush1.msra.mxu0 %v121_v8  ;;  %576 = vmatpush1.msra.mxu1 %v121_v8 }
   0xe   :  { %145 = vmatprep.subr.mxu0 %v751_v21  ;;  %561 = vmatprep.subr.mxu1 %v751_v21 }
   0xf   :  { %8 = vsyncpa [#allocation3], 0  ;;  %146 = vmatpush1.msra.mxu0 %v119_v10  ;;  %577 = vmatpush1.msra.mxu1 %v119_v10  ;;  %v768_v24 = vld [vmem:[%s1005_s0 + $0x78] sm:$0xff]  ;;  %v775_v25 = vld [vmem:[%s1005_s0 + $0x68] sm:$0xff]  ;;  %v637_v34 = vmov 0.0   ;;  %vm39_vm0 = vcmask 588800  }
  0x10   :  { %147 = vmatprep.subr.mxu0 %v761_v23  ;;  %562 = vmatprep.subr.mxu1 %v761_v23  ;;  %v782_v26 = vld [vmem:[%s1005_s0 + $0x58] sm:$0xff]  ;;  %v110_v27 = vld [vmem:[%s1005_s0 + $0x48] sm:$0xff]  ;;  %v93_v32 = vld [vmem:[%s1006_s1] sm:$0xff]  ;;  %52 = vst.msk [vmem:[#allocation2 + $0x68] sm:$0xff] %vm39_vm0, %v775_v25 }
  0x11   :  { %148 = vmatpush1.msra.mxu0 %v117_v11  ;;  %578 = vmatpush1.msra.mxu1 %v117_v11  ;;  %v108_v28 = vld [vmem:[%s1005_s0 + $0x38] sm:$0xff]  ;;  %v106_v29 = vld [vmem:[%s1005_s0 + $0x28] sm:$0xff]  ;;  %v97_v33 = vld [vmem:[%s1006_s1 + $0x20] sm:$0xff]  ;;  %48 = vst.msk [vmem:[#allocation2 + $0x48] sm:$0xff] %vm39_vm0, %v110_v27 }
  0x12   :  { %149 = vmatprep.subr.mxu0 %v768_v24  ;;  %563 = vmatprep.subr.mxu1 %v768_v24  ;;  %v104_v30 = vld [vmem:[%s1005_s0 + $0x18] sm:$0xff]  ;;  %v102_v31 = vld [vmem:[%s1005_s0 + $0x8] sm:$0xff]  ;;  %v95_v37 = vld [vmem:[%s1006_s1 + $0x10] sm:$0xff]  ;;  %44 = vst.msk [vmem:[#allocation2 + $0x28] sm:$0xff] %vm39_vm0, %v106_v29 }
  0x13   :  { %150 = vmatpush1.msra.mxu0 %v115_v12  ;;  %579 = vmatpush1.msra.mxu1 %v115_v12  ;;  %v94_v35 = vld [vmem:[%s1006_s1 + $0x8] sm:$0xff]  ;;  %v99_v38 = vld [vmem:[%s1006_s1 + $0x30] sm:$0xff]  ;;  %v96_v39 = vld [vmem:[%s1006_s1 + $0x18] sm:$0xff]  ;;  %40 = vst.msk [vmem:[#allocation2 + $0x8] sm:$0xff] %vm39_vm0, %v102_v31 }
  0x14   :  { %151 = vmatprep.subr.mxu0 %v775_v25  ;;  %564 = vmatprep.subr.mxu1 %v775_v25  ;;  %v98_v36 = vld [vmem:[%s1006_s1 + $0x28] sm:$0xff]  ;;  %v100_v40 = vld [vmem:[%s1006_s1 + $0x38] sm:$0xff]  ;;  %42 = vst.msk [vmem:[#allocation2 + $0x18] sm:$0xff] %vm39_vm0, %v104_v30  ;;  %46 = vst.msk [vmem:[#allocation2 + $0x38] sm:$0xff] %vm39_vm0, %v108_v28 }
  0x15   :  { %152 = vmatpush1.msra.mxu0 %v113_v14  ;;  %580 = vmatpush1.msra.mxu1 %v113_v14  ;;  %50 = vst.msk [vmem:[#allocation2 + $0x58] sm:$0xff] %vm39_vm0, %v782_v26  ;;  %54 = vst.msk [vmem:[#allocation2 + $0x78] sm:$0xff] %vm39_vm0, %v768_v24 }
  0x16   :  { %153 = vmatprep.subr.mxu0 %v782_v26  ;;  %565 = vmatprep.subr.mxu1 %v782_v26  ;;  %78 = vst.msk [vmem:[#allocation2 + $0x88] sm:$0xff] %vm39_vm0, %v761_v23  ;;  %80 = vst.msk [vmem:[#allocation2 + $0x98] sm:$0xff] %vm39_vm0, %v751_v21 }
  0x17   :  { %154 = vmatpush1.msra.mxu0 %v111_v15  ;;  %581 = vmatpush1.msra.mxu1 %v111_v15  ;;  %82 = vst.msk [vmem:[#allocation2 + $0xa8] sm:$0xff] %vm39_vm0, %v735_v17  ;;  %84 = vst.msk [vmem:[#allocation2 + $0xb8] sm:$0xff] %vm39_vm0, %v719_v13 }
  0x18   :  { %155 = vmatprep.subr.mxu0 %v110_v27  ;;  %566 = vmatprep.subr.mxu1 %v110_v27  ;;  %86 = vst.msk [vmem:[#allocation2 + $0xc8] sm:$0xff] %vm39_vm0, %v703_v9  ;;  %88 = vst.msk [vmem:[#allocation2 + $0xd8] sm:$0xff] %vm39_vm0, %v687_v5  ;;  %v638_v9 = vmov 1  }
  0x19   :  { %156 = vmatpush1.msra.mxu0 %v109_v16  ;;  %582 = vmatpush1.msra.mxu1 %v109_v16  ;;  %90 = vst.msk [vmem:[#allocation2 + $0xe8] sm:$0xff] %vm39_vm0, %v674_v2  ;;  %92 = vst.msk [vmem:[#allocation2 + $0xf8] sm:$0xff] %vm39_vm0, %v666_v0 }
  0x1a   :  { %157 = vmatprep.subr.mxu0 %v108_v28  ;;  %567 = vmatprep.subr.mxu1 %v108_v28 }
  0x1b   :  { %158 = vmatpush1.msra.mxu0 %v107_v18  ;;  %583 = vmatpush1.msra.mxu1 %v107_v18 }
  0x1c   :  { %159 = vmatprep.subr.mxu0 %v106_v29  ;;  %568 = vmatprep.subr.mxu1 %v106_v29 }
  0x1d   :  { %160 = vmatpush1.msra.mxu0 %v105_v19  ;;  %584 = vmatpush1.msra.mxu1 %v105_v19 }
  0x1e   :  { %161 = vmatprep.subr.mxu0 %v104_v30  ;;  %569 = vmatprep.subr.mxu1 %v104_v30 }
  0x1f   :  { %162 = vmatpush1.msra.mxu0 %v103_v20  ;;  %585 = vmatpush1.msra.mxu1 %v103_v20 }
  0x20   :  { %163 = vmatprep.subr.mxu0 %v102_v31  ;;  %570 = vmatprep.subr.mxu1 %v102_v31 }
  0x21   :  { %164 = vmatpush1.msra.mxu0 %v101_v22  ;;  %586 = vmatpush1.msra.mxu1 %v101_v22 }
  0x22   :  { %197 = vmatprep.mubr.f32.mxu0 %v637_v34  ;;  %221 = vmatprep.mubr.f32.mxu1 %v637_v34 }
  0x23   :  { %198 = vmatmul.mubr.f32.vlgmr.msra.gmra.mxu0 %v93_v32  ;;  %222 = vmatmul.mubr.f32.vlgmr.msra.gmra.mxu1 %v97_v33 }
  0x24   :  { %203 = vmatprep.mubr.f32.mxu0 %v637_v34  ;;  %227 = vmatprep.mubr.f32.mxu1 %v637_v34 }
  0x25   :  { %593 = vset.pattern.permute.xlu1 %v638_v9  ;;  %594 = vset.pattern.permute.xlu0 %v638_v9 }
  0x27   :  { %204 = vmatmul.mubr.f32.gmra.mxu0 %v94_v35  ;;  %228 = vmatmul.mubr.f32.gmra.mxu1 %v98_v36 }
  0x28   :  { %209 = vmatprep.mubr.f32.mxu0 %v637_v34  ;;  %233 = vmatprep.mubr.f32.mxu1 %v637_v34 }
  0x2b   :  { %210 = vmatmul.mubr.f32.gmra.mxu0 %v95_v37  ;;  %234 = vmatmul.mubr.f32.gmra.mxu1 %v99_v38 }
  0x2c   :  { %215 = vmatprep.mubr.f32.mxu0 %v637_v34  ;;  %239 = vmatprep.mubr.f32.mxu1 %v637_v34 }
  0x2f   :  { %216 = vmatmul.mubr.f32.gmra.mxu0 %v96_v39  ;;  %240 = vmatmul.mubr.f32.gmra.mxu1 %v100_v40 }
  0xe3   :  { %v199_v41 = vpop.f32.mrf.mxu0  ;;  %v223_v42 = vpop.f32.mrf.mxu1 }
  0xe5   :  { %v201_v43 = vpop.f32.mrf.mxu0  ;;  %v225_v44 = vpop.f32.mrf.mxu1 }
  0xe6   :  { %v246_v45 = vsel %vm39_vm0, %v201_v43, 0.0  ;;  %v262_v49 = vsel %vm39_vm0, %v225_v44, 0.0 }
  0xe7   :  { %v205_v46 = vpop.f32.mrf.mxu0  ;;  %v855_v47 = vpop.f32.mrf.mxu1  ;;  %v247_v48 = vadd.f32 %v246_v45, %v199_v41  ;;  %v263_v55 = vadd.f32 %v262_v49, %v223_v42 }
  0xe9   :  { %v207_v50 = vpop.f32.mrf.mxu0  ;;  %v231_v51 = vpop.f32.mrf.mxu1  ;;  %248 = vadd.xlane.f32.xlu0 %v247_v48 }
  0xea   :  { %v266_v52 = vsel %vm39_vm0, %v231_v51, 0.0  ;;  %v250_v57 = vsel %vm39_vm0, %v207_v50, 0.0 }
  0xeb   :  { %v211_v53 = vpop.f32.mrf.mxu0  ;;  %v267_v54 = vadd.f32 %v266_v52, %v855_v47  ;;  %v860_v56 = vpop.f32.mrf.mxu1  ;;  %v251_v0 = vadd.f32 %v250_v57, %v205_v46 }
  0xed   :  { %v213_v58 = vpop.f32.mrf.mxu0  ;;  %268 = vadd.xlane.f32.xlu1 %v267_v54  ;;  %264 = vadd.xlane.f32.xlu0 %v263_v55  ;;  %v237_v59 = vpop.f32.mrf.mxu1 }
  0xee   :  { %v254_v60 = vsel %vm39_vm0, %v213_v58, 0.0  ;;  %v270_v61 = vsel %vm39_vm0, %v237_v59, 0.0 }
  0xef   :  { %v217_v62 = vpop.f32.mrf.mxu0  ;;  %v255_v63 = vadd.f32 %v254_v60, %v211_v53  ;;  %v865_v1 = vpop.f32.mrf.mxu1  ;;  %v271_v4 = vadd.f32 %v270_v61, %v860_v56 }
  0xf1   :  { %v219_v2 = vpop.f32.mrf.mxu0  ;;  %256 = vadd.xlane.f32.xlu1 %v255_v63  ;;  %252 = vadd.xlane.f32.xlu0 %v251_v0  ;;  %v867_v3 = vpop.f32.mrf.mxu1 }
  0xf2   :  { %v258_v5 = vsel %vm39_vm0, %v219_v2, 0.0  ;;  %v274_v6 = vsel %vm39_vm0, %v867_v3, 0.0 }
  0xf3   :  { %v259_v7 = vadd.f32 %v258_v5, %v217_v62  ;;  %v275_v8 = vadd.f32 %v274_v6, %v865_v1 }
  0xf5   :  { %260 = vadd.xlane.f32.xlu1 %v259_v7  ;;  %272 = vadd.xlane.f32.xlu0 %v271_v4 }
  0xf9   :  { %276 = vadd.xlane.f32.xlu1 %v275_v8 }
 0x172   :  { %v249_v10 = vpop.xlane.xlu0 %248 }
 0x173   :  { %v278_v11 = vmul.f32 0.005, %v249_v10 }
 0x175   :  { %v876_v12 = vsub.f32 %v199_v41, %v278_v11  ;;  %v878_v13 = vsub.f32 %v201_v43, %v278_v11  ;;  %v359_v11 = vld [vmem:[%s1007_s2 + $0x8] sm:$0xff] }
 0x176   :  { %v269_v14 = vpop.xlane.xlu1 %268  ;;  %v265_v15 = vpop.xlane.xlu0 %264 }
 0x177   :  { %v282_v16 = vmul.f32 0.005, %v265_v15  ;;  %v302_v17 = vmul.f32 %v876_v12, %v876_v12  ;;  %v303_v18 = vmul.f32 %v878_v13, %v878_v13  ;;  %v283_v19 = vmul.f32 0.005, %v269_v14  ;;  %v358_v14 = vld [vmem:[%s1007_s2] sm:$0xff] }
 0x178   :  { %v362_v15 = vld [vmem:[%s1007_s2 + $0x20] sm:$0xff] }
 0x179   :  { %v884_v20 = vsub.f32 %v223_v42, %v282_v16  ;;  %v886_v21 = vsub.f32 %v225_v44, %v282_v16  ;;  %v318_v24 = vsel %vm39_vm0, %v303_v18, 0.0  ;;  %v891_v29 = vsub.f32 %v231_v51, %v283_v19  ;;  %v360_v16 = vld [vmem:[%s1007_s2 + $0x10] sm:$0xff] }
 0x17a   :  { %v257_v22 = vpop.xlane.xlu1 %256  ;;  %v253_v23 = vpop.xlane.xlu0 %252  ;;  %v319_v27 = vadd.f32 %v318_v24, %v302_v17  ;;  %v904_v35 = vsub.f32 %v855_v47, %v283_v19  ;;  %v361_v17 = vld [vmem:[%s1007_s2 + $0x18] sm:$0xff]  ;;  %v639_v18 = vmov 0   ;;  %v363_v19 = vld [vmem:[%s1007_s2 + $0x28] sm:$0xff] }
 0x17b   :  { %v280_v25 = vmul.f32 0.005, %v257_v22  ;;  %v279_v26 = vmul.f32 0.005, %v253_v23  ;;  %v310_v28 = vmul.f32 %v884_v20, %v884_v20  ;;  %v311_v30 = vmul.f32 %v886_v21, %v886_v21 }
 0x17c   :  { %320 = vadd.xlane.f32.xlu0 %v319_v27  ;;  %v312_v54 = vmul.f32 %v904_v35, %v904_v35 }
 0x17d   :  { %v895_v31 = vsub.f32 %v211_v53, %v280_v25  ;;  %v897_v32 = vsub.f32 %v213_v58, %v280_v25  ;;  %v899_v33 = vsub.f32 %v205_v46, %v279_v26  ;;  %v901_v34 = vsub.f32 %v207_v50, %v279_v26 }
 0x17e   :  { %v261_v36 = vpop.xlane.xlu1 %260  ;;  %v273_v37 = vpop.xlane.xlu0 %272  ;;  %v334_v38 = vsel %vm39_vm0, %v311_v30, 0.0  ;;  %v313_v46 = vmul.f32 %v891_v29, %v891_v29 }
 0x17f   :  { %v281_v39 = vmul.f32 0.005, %v261_v36  ;;  %v284_v40 = vmul.f32 0.005, %v273_v37  ;;  %v335_v41 = vadd.f32 %v334_v38, %v310_v28  ;;  %v306_v42 = vmul.f32 %v895_v31, %v895_v31 }
 0x180   :  { %v307_v43 = vmul.f32 %v897_v32, %v897_v32  ;;  %v304_v44 = vmul.f32 %v899_v33, %v899_v33  ;;  %v305_v45 = vmul.f32 %v901_v34, %v901_v34 }
 0x181   :  { %v917_v47 = vsub.f32 %v219_v2, %v281_v39  ;;  %v920_v48 = vsub.f32 %v860_v56, %v284_v40  ;;  %v922_v49 = vsub.f32 %v237_v59, %v284_v40  ;;  %336 = vadd.xlane.f32.xlu0 %v335_v41  ;;  %v924_v50 = vsub.f32 %v217_v62, %v281_v39 }
 0x182   :  { %v277_v51 = vpop.xlane.xlu1 %276  ;;  %v326_v52 = vsel %vm39_vm0, %v307_v43, 0.0  ;;  %v322_v53 = vsel %vm39_vm0, %v305_v45, 0.0  ;;  %v338_v59 = vsel %vm39_vm0, %v313_v46, 0.0 }
 0x183   :  { %v285_v55 = vmul.f32 0.005, %v277_v51  ;;  %v327_v57 = vadd.f32 %v326_v52, %v306_v42  ;;  %v323_v58 = vadd.f32 %v322_v53, %v304_v44  ;;  %v314_v56 = vmul.f32 %v920_v48, %v920_v48 }
 0x184   :  { %v315_v60 = vmul.f32 %v922_v49, %v922_v49  ;;  %v309_v61 = vmul.f32 %v917_v47, %v917_v47  ;;  %v339_v2 = vadd.f32 %v338_v59, %v312_v54  ;;  %v308_v5 = vmul.f32 %v924_v50, %v924_v50  ;;  %v364_v59 = vld [vmem:[%s1007_s2 + $0x30] sm:$0xff] }
 0x185   :  { %v938_v62 = vsub.f32 %v867_v3, %v285_v55  ;;  %328 = vadd.xlane.f32.xlu0 %v327_v57  ;;  %324 = vadd.xlane.f32.xlu1 %v323_v58  ;;  %v942_v0 = vsub.f32 %v865_v1, %v285_v55 }
 0x186   :  { %v342_v63 = vsel %vm39_vm0, %v315_v60, 0.0  ;;  %v330_v6 = vsel %vm39_vm0, %v309_v61, 0.0 }
 0x187   :  { %v343_v4 = vadd.f32 %v342_v63, %v314_v56  ;;  %v317_v7 = vmul.f32 %v938_v62, %v938_v62  ;;  %v331_v3 = vadd.f32 %v330_v6, %v308_v5  ;;  %v316_v8 = vmul.f32 %v942_v0, %v942_v0 }
 0x189   :  { %340 = vadd.xlane.f32.xlu1 %v339_v2  ;;  %344 = vadd.xlane.f32.xlu0 %v343_v4  ;;  %v346_v10 = vsel %vm39_vm0, %v317_v7, 0.0 }
 0x18a   :  { %v347_v1 = vadd.f32 %v346_v10, %v316_v8 }
 0x18d   :  { %332 = vadd.xlane.f32.xlu1 %v331_v3 }
 0x191   :  { %348 = vadd.xlane.f32.xlu1 %v347_v1 }
 0x19f   :  { %453 = vperm.xlu0 %594, %v359_v11  }
 0x1a2   :  { %448 = vperm.xlu1 %593, %v358_v14  }
 0x1a3   :  { %468 = vperm.xlu0 %594, %v362_v15  }
 0x1a6   :  { %458 = vperm.xlu1 %593, %v360_v16  }
 0x1a7   :  { %595 = vset.pattern.permute.xlu0 %v639_v18 }
 0x1aa   :  { %463 = vperm.xlu1 %593, %v361_v17  }
 0x1ae   :  { %473 = vperm.xlu1 %593, %v363_v19  }
 0x1b2   :  { %596 = vset.pattern.permute.xlu1 %v639_v18 }
 0x205   :  { %v321_v22 = vpop.xlane.xlu0 %320 }
 0x206   :  { %v350_v23 = vmul.f32 0.005, %v321_v22 }
 0x208   :  { %v366_v24 = vadd.f32 1e-05, %v350_v23 }
 0x20a   :  { %v337_v25 = vpop.xlane.xlu0 %336  ;;  %599 = vrsqrt.f32 %v366_v24 }
 0x20b   :  { %v354_v26 = vmul.f32 0.005, %v337_v25 }
 0x20d   :  { %v370_v27 = vadd.f32 1e-05, %v354_v26 }
 0x20e   :  { %v325_v28 = vpop.xlane.xlu1 %324  ;;  %v329_v30 = vpop.xlane.xlu0 %328 }
 0x20f   :  { %601 = vrsqrt.f32 %v370_v27  ;;  %v351_v36 = vmul.f32 0.005, %v325_v28  ;;  %v352_v38 = vmul.f32 0.005, %v329_v30 }
 0x211   :  { %v367_v37 = vadd.f32 1e-05, %v351_v36  ;;  %v368_v42 = vadd.f32 1e-05, %v352_v38 }
 0x212   :  { %v341_v39 = vpop.xlane.xlu1 %340  ;;  %v345_v40 = vpop.xlane.xlu0 %344 }
 0x213   :  { %603 = vrsqrt.f32 %v367_v37  ;;  %v355_v41 = vmul.f32 0.005, %v341_v39  ;;  %v356_v44 = vmul.f32 0.005, %v345_v40 }
 0x215   :  { %v371_v43 = vadd.f32 1e-05, %v355_v41  ;;  %v372_v51 = vadd.f32 1e-05, %v356_v44 }
 0x216   :  { %v333_v45 = vpop.xlane.xlu1 %332 }
 0x217   :  { %605 = vrsqrt.f32 %v371_v43  ;;  %v600_v46 = vpop.eup %599  ;;  %v353_v52 = vmul.f32 0.005, %v333_v45 }
 0x218   :  { %607 = vrsqrt.f32 %v368_v42  ;;  %v382_v53 = vmul.f32 %v600_v46, %v358_v14 }
 0x219   :  { %609 = vrsqrt.f32 %v372_v51  ;;  %v369_v57 = vadd.f32 1e-05, %v353_v52 }
 0x21a   :  { %v349_v54 = vpop.xlane.xlu1 %348  ;;  %392 = vperm.xlu0 %595, %v382_v53  }
 0x21b   :  { %v357_v56 = vmul.f32 0.005, %v349_v54  ;;  %611 = vrsqrt.f32 %v369_v57 }
 0x21c   :  { %v602_v55 = vpop.eup %601 }
 0x21d   :  { %v386_v58 = vmul.f32 %v602_v55, %v362_v15  ;;  %v373_v63 = vadd.f32 1e-05, %v357_v56 }
 0x21e   :  { %597 = vset.pattern.permute.xlu0 %v638_v9  ;;  %v449_v15 = vpop.permute.xlu1 %448 }
 0x21f   :  { %412 = vperm.xlu1 %596, %v386_v58   ;;  %478 = vperm.xlu0 %597, %v364_v59   ;;  %613 = vrsqrt.f32 %v373_v63 }
 0x220   :  { %v604_v60 = vpop.eup %603 }
 0x221   :  { %v383_v61 = vmul.f32 %v604_v60, %v359_v11  ;;  %v365_v11 = vld [vmem:[%s1007_s2 + $0x38] sm:$0xff]  ;;  %s640_s2 = smov [#allocation2]  }
 0x222   :  { %v459_v18 = vpop.permute.xlu1 %458  ;;  %s524_s25 = sshll.u32 %s640_s2, 4  ;;  %s525_s25 = int_to_ptr.vmem [resolvable:$true] %s524_s25 }
 0x223   :  { %397 = vperm.xlu1 %596, %v383_v61   ;;  %s615_s0 = scalar_lea.vmem %s525_s25, 6144  ;;  %p620_p1 = scmp.lt.s32.totalorder %s525_s25, %s525_s25 }
 0x224   :  { %v606_v2 = vpop.eup %605  ;;  %p616_p0 = scmp.ne.s32.totalorder %s525_s25, %s615_s0  ;;  %p621_p2 = scmp.lt.s32.totalorder %s615_s0, %s615_s0 }
 0x225   :  { %v387_v4 = vmul.f32 %v606_v2, %v363_v19  ;;  %v608_v5 = vpop.eup %607 }
 0x226   :  { %v384_v6 = vmul.f32 %v608_v5, %v360_v16  ;;  %v610_v7 = vpop.eup %609  ;;  %v454_v16 = vpop.permute.xlu0 %453  ;;  %p622_p3 = por %p621_p2, %p620_p1 }
 0x227   :  { %417 = vperm.xlu1 %596, %v387_v4   ;;  %v388_v3 = vmul.f32 %v610_v7, %v364_v59  ;;  %v464_v19 = vpop.permute.xlu1 %463 }
 0x228   :  { %v612_v8 = vpop.eup %611  ;;  %p623_p4 = pnand %p622_p3, %p616_p0 }
 0x229   :  { %v385_v10 = vmul.f32 %v612_v8, %v361_v17 }
 0x22a   :  { %v469_v22 = vpop.permute.xlu0 %468 }
 0x22b   :  { %402 = vperm.xlu1 %596, %v384_v6   ;;  %v474_v23 = vpop.permute.xlu1 %473 }
 0x22c   :  { %v614_v1 = vpop.eup %613 }
 0x22d   :  { %v389_v14 = vmul.f32 %v614_v1, %v365_v11 }
 0x22f   :  { %422 = vperm.xlu1 %596, %v388_v3  }
 0x233   :  { %407 = vperm.xlu1 %596, %v385_v10  }
 0x237   :  { %427 = vperm.xlu1 %596, %v389_v14  }
 0x23b   :  { %598 = vset.pattern.permute.xlu1 %v638_v9 }
 0x23c   :  { %483 = vperm.xlu1 %598, %v365_v11  }
 0x295   :  { %v393_v24 = vpop.permute.xlu0 %392 }
 0x296   :  { %v430_v17 = vmul.f32 %v393_v24, %v876_v12  ;;  %v431_v25 = vmul.f32 %v393_v24, %v878_v13 }
 0x298   :  { %v486_v26 = vadd.f32 %v449_v15, %v430_v17  ;;  %v487_v27 = vadd.f32 %v449_v15, %v431_v25 }
 0x29a   :  { %v413_v28 = vpop.permute.xlu1 %412  ;;  %503 = vst [vmem:[#allocation2 + $0x100] sm:$0xff] %v486_v26  ;;  %504 = vst.msk [vmem:[#allocation2 + $0x108] sm:$0xff] %vm39_vm0, %v487_v27  ;;  %v479_v52 = vpop.permute.xlu0 %478 }
 0x29b   :  { %v438_v9 = vmul.f32 %v413_v28, %v884_v20  ;;  %v439_v30 = vmul.f32 %v413_v28, %v886_v21 }
 0x29d   :  { %v494_v36 = vadd.f32 %v469_v22, %v438_v9  ;;  %v495_v37 = vadd.f32 %v469_v22, %v439_v30 }
 0x29e   :  { %v398_v38 = vpop.permute.xlu1 %397 }
 0x29f   :  { %511 = vst [vmem:[#allocation2 + $0x140] sm:$0xff] %v494_v36  ;;  %512 = vst.msk [vmem:[#allocation2 + $0x148] sm:$0xff] %vm39_vm0, %v495_v37  ;;  %v432_v12 = vmul.f32 %v398_v38, %v899_v33  ;;  %v433_v13 = vmul.f32 %v398_v38, %v901_v34 }
 0x2a1   :  { %v488_v39 = vadd.f32 %v454_v16, %v432_v12  ;;  %v489_v40 = vadd.f32 %v454_v16, %v433_v13 }
 0x2a2   :  { %v418_v41 = vpop.permute.xlu1 %417 }
 0x2a3   :  { %505 = vst [vmem:[#allocation2 + $0x110] sm:$0xff] %v488_v39  ;;  %506 = vst.msk [vmem:[#allocation2 + $0x118] sm:$0xff] %vm39_vm0, %v489_v40  ;;  %v440_v20 = vmul.f32 %v418_v41, %v904_v35  ;;  %v441_v21 = vmul.f32 %v418_v41, %v891_v29 }
 0x2a5   :  { %v496_v42 = vadd.f32 %v474_v23, %v440_v20  ;;  %v497_v43 = vadd.f32 %v474_v23, %v441_v21 }
 0x2a6   :  { %v403_v44 = vpop.permute.xlu1 %402 }
 0x2a7   :  { %513 = vst [vmem:[#allocation2 + $0x150] sm:$0xff] %v496_v42  ;;  %514 = vst.msk [vmem:[#allocation2 + $0x158] sm:$0xff] %vm39_vm0, %v497_v43  ;;  %v434_v33 = vmul.f32 %v403_v44, %v895_v31  ;;  %v435_v34 = vmul.f32 %v403_v44, %v897_v32 }
 0x2a9   :  { %v490_v45 = vadd.f32 %v459_v18, %v434_v33  ;;  %v491_v46 = vadd.f32 %v459_v18, %v435_v34 }
 0x2aa   :  { %v423_v51 = vpop.permute.xlu1 %422 }
 0x2ab   :  { %507 = vst [vmem:[#allocation2 + $0x120] sm:$0xff] %v490_v45  ;;  %508 = vst.msk [vmem:[#allocation2 + $0x128] sm:$0xff] %vm39_vm0, %v491_v46  ;;  %v442_v35 = vmul.f32 %v423_v51, %v920_v48  ;;  %v443_v29 = vmul.f32 %v423_v51, %v922_v49 }
 0x2ad   :  { %v498_v53 = vadd.f32 %v479_v52, %v442_v35  ;;  %v499_v54 = vadd.f32 %v479_v52, %v443_v29 }
 0x2ae   :  { %v408_v55 = vpop.permute.xlu1 %407 }
 0x2af   :  { %515 = vst [vmem:[#allocation2 + $0x160] sm:$0xff] %v498_v53  ;;  %516 = vst.msk [vmem:[#allocation2 + $0x168] sm:$0xff] %vm39_vm0, %v499_v54  ;;  %v436_v31 = vmul.f32 %v408_v55, %v924_v50  ;;  %v437_v32 = vmul.f32 %v408_v55, %v917_v47 }
 0x2b1   :  { %v492_v57 = vadd.f32 %v464_v19, %v436_v31  ;;  %v493_v58 = vadd.f32 %v464_v19, %v437_v32 }
 0x2b2   :  { %v428_v56 = vpop.permute.xlu1 %427 }
 0x2b3   :  { %509 = vst [vmem:[#allocation2 + $0x130] sm:$0xff] %v492_v57  ;;  %510 = vst.msk [vmem:[#allocation2 + $0x138] sm:$0xff] %vm39_vm0, %v493_v58  ;;  %v444_v48 = vmul.f32 %v428_v56, %v942_v0  ;;  %v445_v49 = vmul.f32 %v428_v56, %v938_v62 }
 0x2b7   :  { %v484_v59 = vpop.permute.xlu1 %483 }
 0x2b8   :  { %v500_v60 = vadd.f32 %v484_v59, %v444_v48  ;;  %v501_v61 = vadd.f32 %v484_v59, %v445_v49 }
 0x2ba   :  { %517 = vst [vmem:[#allocation2 + $0x170] sm:$0xff] %v500_v60  ;;  %518 = vst.msk [vmem:[#allocation2 + $0x178] sm:$0xff] %vm39_vm0, %v501_v61 }
 0x2bb   :  { %626 = shalt.err (!%p623_p4)
}
 0x2bc   :  { %s641_s26 = smov 256   ;;  %s642_s27 = smov 16  }
 0x2bd   :  { %530 = dma.vmem_to_hbm [thread:$0]  %s525_s25, 6144, %s1008_s3, [#allocation3], %s641_s26, %s641_s26, %s642_s27  }
 0x2be   :  { %635 = dma.done.wait [#allocation3], 6144  }
 0x2bf   :  { %636 = vsyncadd [#allocation3], 4294961152 }
 0x2c0   :  { %534 = vsyncpa [#allocation3], 1 }

</bundles_post_ra>
